<compile_context>
chip_gen: v6e
topology: v6e:2x2x1
jax: 0.10.0
libtpu: 0.0.40
codegen_flags: <defaults>
</compile_context>

<pallas_src>
import math

import jax
import jax.numpy as jnp
from jax.experimental import pallas as pl
from jax.experimental.pallas import tpu as pltpu

EPS = 1e-5
LANES = 128
_PAD_OFF = 1  # left offset of the valid W columns inside the lane-padded strip


# ----------------------------------------------------------------------------- #
# Wrapper-side constant builders (plain JAX, run once per weight update).
# ----------------------------------------------------------------------------- #
def _padded_width(W, C):
    """Smallest Wp >= W + 2 with Wp*C a multiple of 128 (lane-aligned row strips)."""
    step = LANES // math.gcd(LANES, C)
    return ((W + 2 + step - 1) // step) * step


def _per_dy_blocked_weight(w_oihw, W, wp_in, off_in, wp_out, off_out):
    """OIHW (Co,Ci,3,3) -> (3, wp_in*Ci, wp_out*Co) per-dy blocked weights (f32).

    Row index   = j*Ci + ci   (j = column in the lane-padded input strip)
    Col index   = p*Co + co   (p = column in the lane-padded output strip)
    Entry(dy)   = sum_dx [p valid] * [j == off_in + (p-off_out) + dx - 1] * k[dy,dx,ci,co]
    Built with an exact broadcast-multiply-sum (0/1 selector, no reduced-precision dot).
    """
    k = jnp.transpose(w_oihw, (2, 3, 1, 0)).astype(jnp.float32)        # (KH, KW, Ci, Co)
    KH, KW, Ci, Co = k.shape
    j = jnp.arange(wp_in)
    p = jnp.arange(wp_out)
    wq = p - off_out
    valid = (wq >= 0) & (wq < W)                                        # (wp_out,)
    dx = jnp.arange(KW)
    target = off_in + wq[None, :] + dx[:, None] - 1                     # (KW, wp_out)
    sel = ((j[None, :, None] == target[:, None, :])
           & valid[None, None, :]).astype(jnp.float32)                  # (KW, wp_in, wp_out)
    prod = (sel[None, :, :, None, :, None]                              # (1,KW,wp_in,1,wp_out,1)
            * k[:, :, None, :, None, :])                                # (KH,KW,1,Ci,1,Co)
    blocked = prod.sum(axis=1)                                          # (KH, wp_in, Ci, wp_out, Co)
    return blocked.reshape(KH, wp_in * Ci, wp_out * Co)


def prepare_vgg_params(params, W):
    """Build bf16 per-dy blocked weights + BN affine params once per weight update."""
    w1, b1, g1, be1, w2, b2, g2, be2 = params
    # Conv biases are intentionally unused: training-mode BatchNorm subtracts the
    # per-channel batch mean, which cancels any per-channel conv bias exactly.
    del b1, b2
    Cin = w1.shape[1]
    Cmid = w1.shape[0]
    wp1 = _padded_width(W, Cin)      # conv1 input lane-padded width
    wp2 = _padded_width(W, Cmid)     # conv1 output / conv2 input lane-padded width
    w1b = _per_dy_blocked_weight(w1, W, wp1, _PAD_OFF, wp2, _PAD_OFF).astype(jnp.bfloat16)
    w2b = _per_dy_blocked_weight(w2, W, wp2, _PAD_OFF, W, 0).astype(jnp.bfloat16)
    return dict(w1b=w1b, w2b=w2b,
                g1=jnp.asarray(g1, jnp.float32), be1=jnp.asarray(be1, jnp.float32),
                g2=jnp.asarray(g2, jnp.float32), be2=jnp.asarray(be2, jnp.float32))


# ----------------------------------------------------------------------------- #
# Kernels
# ----------------------------------------------------------------------------- #
def _conv_rows_dy(lhs_bf16, w_ref):
    """sum_dy row_shift(lhs, dy) @ w_ref[dy], accumulated in f32 on the MXU.

    lhs: (H, K) bf16 tile (rows = image rows); w_ref: (3, K, L) bf16 per-dy weights.
    The horizontal taps + Ci live inside K (blocked per-dy weight), so no lane
    concats are needed; the vertical taps are 1-row sublane shifts of the LHS.
    """
    zrow = jnp.zeros((1, lhs_bf16.shape[1]), lhs_bf16.dtype)            # hoisted, reused
    lhs_dn = jnp.concatenate([zrow, lhs_bf16[:-1]], axis=0)             # row h -> lhs[h-1]
    lhs_up = jnp.concatenate([lhs_bf16[1:], zrow], axis=0)              # row h -> lhs[h+1]
    acc = jnp.dot(lhs_bf16, w_ref[1], preferred_element_type=jnp.float32)
    acc += jnp.dot(lhs_dn, w_ref[0], preferred_element_type=jnp.float32)
    acc += jnp.dot(lhs_up, w_ref[2], preferred_element_type=jnp.float32)
    return acc


def _emit_stats(st_ref, y):
    """Per-lane sum / sum-of-squares partials for this tile (row reductions only)."""
    s = jnp.sum(y, axis=0, keepdims=True)
    ss = jnp.sum(y * y, axis=0, keepdims=True)
    st_ref[0] = jnp.concatenate([s, ss], axis=0)


def _conv_stats_kernel(x_ref, w_ref, y_ref, st_ref):
    # x is already bf16 and lane-padded by the wrapper -> DMA delivers it aligned.
    y = _conv_rows_dy(x_ref[0], w_ref)
    y_ref[0] = y
    _emit_stats(st_ref, y)


def _bn_conv_stats_kernel(y1_ref, sc_ref, sh_ref, w_ref, y2_ref, st_ref):
    # BN1 + ReLU applied on the fly; scale/shift are zero in pad lanes so the
    # horizontal conv padding stays exactly 0 for conv2.
    h = jnp.maximum(y1_ref[0] * sc_ref[...] + sh_ref[...], 0.0)
    y = _conv_rows_dy(h.astype(jnp.bfloat16), w_ref)
    y2_ref[0] = y
    _emit_stats(st_ref, y)


def _bn_relu_kernel(y_ref, sc_ref, sh_ref, o_ref):
    o_ref[0] = jnp.maximum(y_ref[0] * sc_ref[...] + sh_ref[...], 0.0)


# ----------------------------------------------------------------------------- #
# BN finalize helpers (tiny per-channel math between passes).
# ----------------------------------------------------------------------------- #
def _finalize_bn(stats, wp, off, W, gamma, beta, count):
    """(N, 2, wp*C) per-lane partials -> per-channel (scale, shift)."""
    C = gamma.shape[0]
    s = stats.sum(axis=0).reshape(2, wp, C)[:, off:off + W, :].sum(axis=1)   # (2, C)
    mean = s[0] / count
    # TODO(synk): use a shifted / Welford formulation at scale (cancellation risk).
    var = jnp.maximum(s[1] / count - mean * mean, 0.0)
    scale = gamma * jax.lax.rsqrt(var + EPS)
    shift = beta - mean * scale
    return scale, shift


def _tile_lanes(vec, wp, off, W):
    """(C,) per-channel vector -> (1, wp*C) lane row, zero in the pad columns."""
    C = vec.shape[0]
    buf = jnp.zeros((wp, C), jnp.float32)
    buf = buf.at[off:off + W, :].set(jnp.broadcast_to(vec, (W, C)))
    return buf.reshape(1, wp * C)


# ----------------------------------------------------------------------------- #
# Forward pass
# ----------------------------------------------------------------------------- #
@jax.jit
def vgg_block_apply(x_nchw, prep):
    w1b, w2b = prep["w1b"], prep["w2b"]
    g1, be1, g2, be2 = prep["g1"], prep["be1"], prep["g2"], prep["be2"]

    N, Cin, H, W = x_nchw.shape
    Cmid, Cout = g1.shape[0], g2.shape[0]
    wp1, wp2 = _padded_width(W, Cin), _padded_width(W, Cmid)
    o1 = o2 = _PAD_OFF
    L1, L2, L3 = wp1 * Cin, wp2 * Cmid, W * Cout
    count = float(N * H * W)

    # NCHW -> lane-folded, horizontally pre-padded, bf16 input slab (one fused pass).
    x_nhwc = jnp.transpose(x_nchw, (0, 2, 3, 1)).astype(jnp.bfloat16)
    xp = jnp.pad(x_nhwc, ((0, 0), (0, 0), (o1, wp1 - W - o1), (0, 0))).reshape(N, H, L1)

    par = pltpu.CompilerParams(dimension_semantics=("parallel",))

    # Pass 1: conv1 (raw, padded lane layout) + per-image per-lane sum/sumsq partials.
    y1, st1 = pl.pallas_call(
        _conv_stats_kernel,
        out_shape=(jax.ShapeDtypeStruct((N, H, L2), jnp.float32),
                   jax.ShapeDtypeStruct((N, 2, L2), jnp.float32)),
        grid=(N,),
        in_specs=[pl.BlockSpec((1, H, L1), lambda n: (n, 0, 0)),
                  pl.BlockSpec((3, L1, L2), lambda n: (0, 0, 0))],
        out_specs=(pl.BlockSpec((1, H, L2), lambda n: (n, 0, 0)),
                   pl.BlockSpec((1, 2, L2), lambda n: (n, 0, 0))),
        compiler_params=par,
    )(xp, w1b)

    sc1, sh1 = _finalize_bn(st1, wp2, o2, W, g1, be1, count)
    sc1t, sh1t = _tile_lanes(sc1, wp2, o2, W), _tile_lanes(sh1, wp2, o2, W)

    # Pass 2: BN1+ReLU applied on the fly, conv2 (raw) + stats partials.
    y2, st2 = pl.pallas_call(
        _bn_conv_stats_kernel,
        out_shape=(jax.ShapeDtypeStruct((N, H, L3), jnp.float32),
                   jax.ShapeDtypeStruct((N, 2, L3), jnp.float32)),
        grid=(N,),
        in_specs=[pl.BlockSpec((1, H, L2), lambda n: (n, 0, 0)),
                  pl.BlockSpec((1, L2), lambda n: (0, 0)),
                  pl.BlockSpec((1, L2), lambda n: (0, 0)),
                  pl.BlockSpec((3, L2, L3), lambda n: (0, 0, 0))],
        out_specs=(pl.BlockSpec((1, H, L3), lambda n: (n, 0, 0)),
                   pl.BlockSpec((1, 2, L3), lambda n: (n, 0, 0))),
        compiler_params=par,
    )(y1, sc1t, sh1t, w2b)

    sc2, sh2 = _finalize_bn(st2, W, 0, W, g2, be2, count)
    sc2t, sh2t = _tile_lanes(sc2, W, 0, W), _tile_lanes(sh2, W, 0, W)

    # Pass 3: BN2 + ReLU, lane-dense (W*Cout = 128 wide) unmasked stores.
    out_flat = pl.pallas_call(
        _bn_relu_kernel,
        out_shape=jax.ShapeDtypeStruct((N, H, L3), jnp.float32),
        grid=(N,),
        in_specs=[pl.BlockSpec((1, H, L3), lambda n: (n, 0, 0)),
                  pl.BlockSpec((1, L3), lambda n: (0, 0)),
                  pl.BlockSpec((1, L3), lambda n: (0, 0))],
        out_specs=pl.BlockSpec((1, H, L3), lambda n: (n, 0, 0)),
        compiler_params=par,
    )(y2, sc2t, sh2t)

    out = out_flat.reshape(N, H, W, Cout)
    # TODO(synk): keep this lane-folded NHWC layout between stacked VGG blocks
    # instead of transposing back to NCHW at every block boundary.
    return jnp.transpose(out, (0, 3, 1, 2))


# ----------------------------------------------------------------------------- #
# Pure-JAX reference (lax conv + bias + training-mode BN) for correctness check.
# ----------------------------------------------------------------------------- #
def vgg_block_reference(x_nchw, params):
    w1, b1, g1, be1, w2, b2, g2, be2 = params
    x = jnp.transpose(x_nchw, (0, 2, 3, 1)).astype(jnp.float32)

    def conv_bn_relu(x, w, b, g, be):
        y = jax.lax.conv_general_dilated(
            x, jnp.transpose(w, (2, 3, 1, 0)), (1, 1), 'SAME',
            dimension_numbers=('NHWC', 'HWIO', 'NHWC'),
            precision=jax.lax.Precision.HIGHEST) + b
        m = y.mean(axis=(0, 1, 2))
        v = ((y - m) ** 2).mean(axis=(0, 1, 2))
        y = (y - m) * jax.lax.rsqrt(v + EPS) * g + be
        return jnp.maximum(y, 0.0)

    y = conv_bn_relu(x, w1, b1, g1, be1)
    y = conv_bn_relu(y, w2, b2, g2, be2)
    return jnp.transpose(y, (0, 3, 1, 2))


if __name__ == "__main__":
    # Small shapes consistent with VGGBlock(in=4, mid=8, out=8)
    N, Cin, Cmid, Cout, H, W = 2, 4, 8, 8, 16, 16

    key = jax.random.PRNGKey(0)
    ks = jax.random.split(key, 9)
    x = jax.random.normal(ks[0], (N, Cin, H, W), jnp.float32)

    w1 = 0.1 * jax.random.normal(ks[1], (Cmid, Cin, 3, 3), jnp.float32)   # OIHW
    b1 = 0.1 * jax.random.normal(ks[2], (Cmid,), jnp.float32)
    g1 = 1.0 + 0.1 * jax.random.normal(ks[3], (Cmid,), jnp.float32)
    be1 = 0.1 * jax.random.normal(ks[4], (Cmid,), jnp.float32)

    w2 = 0.1 * jax.random.normal(ks[5], (Cout, Cmid, 3, 3), jnp.float32)  # OIHW
    b2 = 0.1 * jax.random.normal(ks[6], (Cout,), jnp.float32)
    g2 = 1.0 + 0.1 * jax.random.normal(ks[7], (Cout,), jnp.float32)
    be2 = 0.1 * jax.random.normal(ks[8], (Cout,), jnp.float32)

    params = (w1, b1, g1, be1, w2, b2, g2, be2)

    prep = prepare_vgg_params(params, W)              # once per weight update
    out = jax.block_until_ready(vgg_block_apply(x, prep))
    ref = jax.block_until_ready(vgg_block_reference(x, params))

    assert out.shape == (N, Cout, H, W), out.shape
    # Tolerance accounts for bf16 MXU operands (f32 accumulation) vs. the f32 reference.
    assert jnp.allclose(out, ref, atol=8e-2, rtol=8e-2), float(jnp.abs(out - ref).max())
    print("KERNEL_OK")
</pallas_src>

<mosaic_0001>
module attributes {stable_mosaic.version = 11 : i64} {
  func.func @_conv_stats_kernel(%arg0: i32, %arg1: memref<1x16x128xbf16, #tpu.memory_space<vmem>>, %arg2: memref<3x128x256xbf16, #tpu.memory_space<vmem>>, %arg3: memref<1x16x256xf32, #tpu.memory_space<vmem>>, %arg4: memref<1x2x256xf32, #tpu.memory_space<vmem>>) attributes {dimension_semantics = [#tpu.dimension_semantics<parallel>], iteration_bounds = array<i64: 2>, scalar_prefetch = 0 : i64, scratch_operands = 0 : i64, tpu.core_type = #tpu.core_type<tc>, window_params = [{transform_indices = @transform_0, window_bounds = array<i64: 1, 16, 128>}, {pipeline_mode = #tpu.pipeline_mode<synchronous>, transform_indices = @transform_1, window_bounds = array<i64: 3, 128, 256>}, {transform_indices = @transform_2, window_bounds = array<i64: 1, 16, 256>}, {transform_indices = @transform_3, window_bounds = array<i64: 1, 2, 256>}]} {
    %c0 = arith.constant 0 : index
    %c0_0 = arith.constant 0 : index
    %c0_1 = arith.constant 0 : index
    %0 = vector.load %arg1[%c0, %c0_0, %c0_1] : memref<1x16x128xbf16, #tpu.memory_space<vmem>>, vector<1x16x128xbf16>
    %1 = vector.shape_cast %0 : vector<1x16x128xbf16> to vector<16x128xbf16>
    %cst = arith.constant 0.000000e+00 : bf16
    %2 = vector.broadcast %cst : bf16 to vector<1x128xbf16>
    %3 = vector.extract_strided_slice %1 {offsets = [0, 0], sizes = [15, 128], strides = [1, 1]} : vector<16x128xbf16> to vector<15x128xbf16>
    %4 = tpu.concatenate %2, %3 in 0 : vector<1x128xbf16>, vector<15x128xbf16> -> vector<16x128xbf16>
    %5 = vector.extract_strided_slice %1 {offsets = [1, 0], sizes = [15, 128], strides = [1, 1]} : vector<16x128xbf16> to vector<15x128xbf16>
    %6 = tpu.concatenate %5, %2 in 0 : vector<15x128xbf16>, vector<1x128xbf16> -> vector<16x128xbf16>
    %c1 = arith.constant 1 : index
    %c0_2 = arith.constant 0 : index
    %c0_3 = arith.constant 0 : index
    %7 = vector.load %arg2[%c1, %c0_2, %c0_3] : memref<3x128x256xbf16, #tpu.memory_space<vmem>>, vector<1x128x256xbf16>
    %8 = vector.shape_cast %7 : vector<1x128x256xbf16> to vector<128x256xbf16>
    %cst_4 = arith.constant dense<0.000000e+00> : vector<16x256xf32>
    %9 = tpu.matmul %1, %8, %cst_4 {dimension_numbers = #tpu.dot_dimension_numbers<[1], [0], [0], [1], [0, 0, 1, 1], [], []>} : vector<16x128xbf16>, vector<128x256xbf16>, vector<16x256xf32> -> vector<16x256xf32>
    %c0_5 = arith.constant 0 : index
    %c0_6 = arith.constant 0 : index
    %c0_7 = arith.constant 0 : index
    %10 = vector.load %arg2[%c0_5, %c0_6, %c0_7] : memref<3x128x256xbf16, #tpu.memory_space<vmem>>, vector<1x128x256xbf16>
    %11 = vector.shape_cast %10 : vector<1x128x256xbf16> to vector<128x256xbf16>
    %cst_8 = arith.constant dense<0.000000e+00> : vector<16x256xf32>
    %12 = tpu.matmul %4, %11, %cst_8 {dimension_numbers = #tpu.dot_dimension_numbers<[1], [0], [0], [1], [0, 0, 1, 1], [], []>} : vector<16x128xbf16>, vector<128x256xbf16>, vector<16x256xf32> -> vector<16x256xf32>
    %13 = arith.addf %9, %12 : vector<16x256xf32>
    %c2 = arith.constant 2 : index
    %c0_9 = arith.constant 0 : index
    %c0_10 = arith.constant 0 : index
    %14 = vector.load %arg2[%c2, %c0_9, %c0_10] : memref<3x128x256xbf16, #tpu.memory_space<vmem>>, vector<1x128x256xbf16>
    %15 = vector.shape_cast %14 : vector<1x128x256xbf16> to vector<128x256xbf16>
    %cst_11 = arith.constant dense<0.000000e+00> : vector<16x256xf32>
    %16 = tpu.matmul %6, %15, %cst_11 {dimension_numbers = #tpu.dot_dimension_numbers<[1], [0], [0], [1], [0, 0, 1, 1], [], []>} : vector<16x128xbf16>, vector<128x256xbf16>, vector<16x256xf32> -> vector<16x256xf32>
    %17 = arith.addf %13, %16 : vector<16x256xf32>
    %c0_12 = arith.constant 0 : index
    %c0_13 = arith.constant 0 : index
    %c0_14 = arith.constant 0 : index
    %18 = vector.load %arg3[%c0_12, %c0_13, %c0_14] : memref<1x16x256xf32, #tpu.memory_space<vmem>>, vector<1x16x256xf32>
    %19 = vector.shape_cast %18 : vector<1x16x256xf32> to vector<16x256xf32>
    %20 = vector.shape_cast %17 : vector<16x256xf32> to vector<1x16x256xf32>
    tpu.vector_store %arg3[%c0_12, %c0_13, %c0_14], %20 {strides = array<i32>} : memref<1x16x256xf32, #tpu.memory_space<vmem>>, vector<1x16x256xf32>,
    %cst_15 = arith.constant dense<0.000000e+00> : vector<256xf32>
    %21 = vector.multi_reduction <add>, %17, %cst_15 [0] : vector<16x256xf32> to vector<256xf32>
    %22 = vector.shape_cast %21 : vector<256xf32> to vector<1x256xf32>
    %23 = arith.mulf %17, %17 : vector<16x256xf32>
    %cst_16 = arith.constant dense<0.000000e+00> : vector<256xf32>
    %24 = vector.multi_reduction <add>, %23, %cst_16 [0] : vector<16x256xf32> to vector<256xf32>
    %25 = vector.shape_cast %24 : vector<256xf32> to vector<1x256xf32>
    %26 = tpu.concatenate %22, %25 in 0 : vector<1x256xf32>, vector<1x256xf32> -> vector<2x256xf32>
    %c0_17 = arith.constant 0 : index
    %c0_18 = arith.constant 0 : index
    %c0_19 = arith.constant 0 : index
    %27 = vector.load %arg4[%c0_17, %c0_18, %c0_19] : memref<1x2x256xf32, #tpu.memory_space<vmem>>, vector<1x2x256xf32>
    %28 = vector.shape_cast %27 : vector<1x2x256xf32> to vector<2x256xf32>
    %29 = vector.shape_cast %26 : vector<2x256xf32> to vector<1x2x256xf32>
    tpu.vector_store %arg4[%c0_17, %c0_18, %c0_19], %29 {strides = array<i32>} : memref<1x2x256xf32, #tpu.memory_space<vmem>>, vector<1x2x256xf32>,
    return
  }
  func.func @transform_0(%arg0: i32) -> (i32, i32, i32) {
    %c0_i32 = arith.constant 0 : i32
    %c0_i32_0 = arith.constant 0 : i32
    %c0_i32_1 = arith.constant 0 : i32
    return %arg0, %c0_i32, %c0_i32_0 : i32, i32, i32
  }
  func.func @transform_1(%arg0: i32) -> (i32, i32, i32) {
    %c0_i32 = arith.constant 0 : i32
    %c0_i32_0 = arith.constant 0 : i32
    %c0_i32_1 = arith.constant 0 : i32
    %c0_i32_2 = arith.constant 0 : i32
    return %c0_i32, %c0_i32_0, %c0_i32_1 : i32, i32, i32
  }
  func.func @transform_2(%arg0: i32) -> (i32, i32, i32) {
    %c0_i32 = arith.constant 0 : i32
    %c0_i32_0 = arith.constant 0 : i32
    %c0_i32_1 = arith.constant 0 : i32
    return %arg0, %c0_i32, %c0_i32_0 : i32, i32, i32
  }
  func.func @transform_3(%arg0: i32) -> (i32, i32, i32) {
    %c0_i32 = arith.constant 0 : i32
    %c0_i32_0 = arith.constant 0 : i32
    %c0_i32_1 = arith.constant 0 : i32
    return %arg0, %c0_i32, %c0_i32_0 : i32, i32, i32
  }
}

module attributes {stable_mosaic.version = 11 : i64} {
  func.func @_bn_conv_stats_kernel(%arg0: i32, %arg1: memref<1x16x256xf32, #tpu.memory_space<vmem>>, %arg2: memref<1x256xf32, #tpu.memory_space<vmem>>, %arg3: memref<1x256xf32, #tpu.memory_space<vmem>>, %arg4: memref<3x256x128xbf16, #tpu.memory_space<vmem>>, %arg5: memref<1x16x128xf32, #tpu.memory_space<vmem>>, %arg6: memref<1x2x128xf32, #tpu.memory_space<vmem>>) attributes {dimension_semantics = [#tpu.dimension_semantics<parallel>], iteration_bounds = array<i64: 2>, scalar_prefetch = 0 : i64, scratch_operands = 0 : i64, tpu.core_type = #tpu.core_type<tc>, window_params = [{transform_indices = @transform_0, window_bounds = array<i64: 1, 16, 256>}, {pipeline_mode = #tpu.pipeline_mode<synchronous>, transform_indices = @transform_1, window_bounds = array<i64: 1, 256>}, {pipeline_mode = #tpu.pipeline_mode<synchronous>, transform_indices = @transform_2, window_bounds = array<i64: 1, 256>}, {pipeline_mode = #tpu.pipeline_mode<synchronous>, transform_indices = @transform_3, window_bounds = array<i64: 3, 256, 128>}, {transform_indices = @transform_4, window_bounds = array<i64: 1, 16, 128>}, {transform_indices = @transform_5, window_bounds = array<i64: 1, 2, 128>}]} {
    %c0 = arith.constant 0 : index
    %c0_0 = arith.constant 0 : index
    %c0_1 = arith.constant 0 : index
    %0 = vector.load %arg1[%c0, %c0_0, %c0_1] : memref<1x16x256xf32, #tpu.memory_space<vmem>>, vector<1x16x256xf32>
    %1 = vector.shape_cast %0 : vector<1x16x256xf32> to vector<16x256xf32>
    %c0_2 = arith.constant 0 : index
    %c0_3 = arith.constant 0 : index
    %2 = vector.load %arg2[%c0_2, %c0_3] : memref<1x256xf32, #tpu.memory_space<vmem>>, vector<1x256xf32>
    %3 = vector.broadcast %2 : vector<1x256xf32> to vector<16x256xf32>
    %4 = arith.mulf %1, %3 : vector<16x256xf32>
    %c0_4 = arith.constant 0 : index
    %c0_5 = arith.constant 0 : index
    %5 = vector.load %arg3[%c0_4, %c0_5] : memref<1x256xf32, #tpu.memory_space<vmem>>, vector<1x256xf32>
    %6 = vector.broadcast %5 : vector<1x256xf32> to vector<16x256xf32>
    %7 = arith.addf %4, %6 : vector<16x256xf32>
    %cst = arith.constant 0.000000e+00 : f32
    %8 = vector.broadcast %cst : f32 to vector<16x256xf32>
    %9 = arith.maximumf %7, %8 : vector<16x256xf32>
    %10 = arith.truncf %9 : vector<16x256xf32> to vector<16x256xbf16>
    %cst_6 = arith.constant 0.000000e+00 : bf16
    %11 = vector.broadcast %cst_6 : bf16 to vector<1x256xbf16>
    %12 = vector.extract_strided_slice %10 {offsets = [0, 0], sizes = [15, 256], strides = [1, 1]} : vector<16x256xbf16> to vector<15x256xbf16>
    %13 = tpu.concatenate %11, %12 in 0 : vector<1x256xbf16>, vector<15x256xbf16> -> vector<16x256xbf16>
    %14 = vector.extract_strided_slice %10 {offsets = [1, 0], sizes = [15, 256], strides = [1, 1]} : vector<16x256xbf16> to vector<15x256xbf16>
    %15 = tpu.concatenate %14, %11 in 0 : vector<15x256xbf16>, vector<1x256xbf16> -> vector<16x256xbf16>
    %c1 = arith.constant 1 : index
    %c0_7 = arith.constant 0 : index
    %c0_8 = arith.constant 0 : index
    %16 = vector.load %arg4[%c1, %c0_7, %c0_8] : memref<3x256x128xbf16, #tpu.memory_space<vmem>>, vector<1x256x128xbf16>
    %17 = vector.shape_cast %16 : vector<1x256x128xbf16> to vector<256x128xbf16>
    %cst_9 = arith.constant dense<0.000000e+00> : vector<16x128xf32>
    %18 = tpu.matmul %10, %17, %cst_9 {dimension_numbers = #tpu.dot_dimension_numbers<[1], [0], [0], [1], [0, 0, 1, 1], [], []>} : vector<16x256xbf16>, vector<256x128xbf16>, vector<16x128xf32> -> vector<16x128xf32>
    %c0_10 = arith.constant 0 : index
    %c0_11 = arith.constant 0 : index
    %c0_12 = arith.constant 0 : index
    %19 = vector.load %arg4[%c0_10, %c0_11, %c0_12] : memref<3x256x128xbf16, #tpu.memory_space<vmem>>, vector<1x256x128xbf16>
    %20 = vector.shape_cast %19 : vector<1x256x128xbf16> to vector<256x128xbf16>
    %cst_13 = arith.constant dense<0.000000e+00> : vector<16x128xf32>
    %21 = tpu.matmul %13, %20, %cst_13 {dimension_numbers = #tpu.dot_dimension_numbers<[1], [0], [0], [1], [0, 0, 1, 1], [], []>} : vector<16x256xbf16>, vector<256x128xbf16>, vector<16x128xf32> -> vector<16x128xf32>
    %22 = arith.addf %18, %21 : vector<16x128xf32>
    %c2 = arith.constant 2 : index
    %c0_14 = arith.constant 0 : index
    %c0_15 = arith.constant 0 : index
    %23 = vector.load %arg4[%c2, %c0_14, %c0_15] : memref<3x256x128xbf16, #tpu.memory_space<vmem>>, vector<1x256x128xbf16>
    %24 = vector.shape_cast %23 : vector<1x256x128xbf16> to vector<256x128xbf16>
    %cst_16 = arith.constant dense<0.000000e+00> : vector<16x128xf32>
    %25 = tpu.matmul %15, %24, %cst_16 {dimension_numbers = #tpu.dot_dimension_numbers<[1], [0], [0], [1], [0, 0, 1, 1], [], []>} : vector<16x256xbf16>, vector<256x128xbf16>, vector<16x128xf32> -> vector<16x128xf32>
    %26 = arith.addf %22, %25 : vector<16x128xf32>
    %c0_17 = arith.constant 0 : index
    %c0_18 = arith.constant 0 : index
    %c0_19 = arith.constant 0 : index
    %27 = vector.load %arg5[%c0_17, %c0_18, %c0_19] : memref<1x16x128xf32, #tpu.memory_space<vmem>>, vector<1x16x128xf32>
    %28 = vector.shape_cast %27 : vector<1x16x128xf32> to vector<16x128xf32>
    %29 = vector.shape_cast %26 : vector<16x128xf32> to vector<1x16x128xf32>
    tpu.vector_store %arg5[%c0_17, %c0_18, %c0_19], %29 {strides = array<i32>} : memref<1x16x128xf32, #tpu.memory_space<vmem>>, vector<1x16x128xf32>,
    %cst_20 = arith.constant dense<0.000000e+00> : vector<128xf32>
    %30 = vector.multi_reduction <add>, %26, %cst_20 [0] : vector<16x128xf32> to vector<128xf32>
    %31 = vector.shape_cast %30 : vector<128xf32> to vector<1x128xf32>
    %32 = arith.mulf %26, %26 : vector<16x128xf32>
    %cst_21 = arith.constant dense<0.000000e+00> : vector<128xf32>
    %33 = vector.multi_reduction <add>, %32, %cst_21 [0] : vector<16x128xf32> to vector<128xf32>
    %34 = vector.shape_cast %33 : vector<128xf32> to vector<1x128xf32>
    %35 = tpu.concatenate %31, %34 in 0 : vector<1x128xf32>, vector<1x128xf32> -> vector<2x128xf32>
    %c0_22 = arith.constant 0 : index
    %c0_23 = arith.constant 0 : index
    %c0_24 = arith.constant 0 : index
    %36 = vector.load %arg6[%c0_22, %c0_23, %c0_24] : memref<1x2x128xf32, #tpu.memory_space<vmem>>, vector<1x2x128xf32>
    %37 = vector.shape_cast %36 : vector<1x2x128xf32> to vector<2x128xf32>
    %38 = vector.shape_cast %35 : vector<2x128xf32> to vector<1x2x128xf32>
    tpu.vector_store %arg6[%c0_22, %c0_23, %c0_24], %38 {strides = array<i32>} : memref<1x2x128xf32, #tpu.memory_space<vmem>>, vector<1x2x128xf32>,
    return
  }
  func.func @transform_0(%arg0: i32) -> (i32, i32, i32) {
    %c0_i32 = arith.constant 0 : i32
    %c0_i32_0 = arith.constant 0 : i32
    %c0_i32_1 = arith.constant 0 : i32
    return %arg0, %c0_i32, %c0_i32_0 : i32, i32, i32
  }
  func.func @transform_1(%arg0: i32) -> (i32, i32) {
    %c0_i32 = arith.constant 0 : i32
    %c0_i32_0 = arith.constant 0 : i32
    %c0_i32_1 = arith.constant 0 : i32
    return %c0_i32, %c0_i32_0 : i32, i32
  }
  func.func @transform_2(%arg0: i32) -> (i32, i32) {
    %c0_i32 = arith.constant 0 : i32
    %c0_i32_0 = arith.constant 0 : i32
    %c0_i32_1 = arith.constant 0 : i32
    return %c0_i32, %c0_i32_0 : i32, i32
  }
  func.func @transform_3(%arg0: i32) -> (i32, i32, i32) {
    %c0_i32 = arith.constant 0 : i32
    %c0_i32_0 = arith.constant 0 : i32
    %c0_i32_1 = arith.constant 0 : i32
    %c0_i32_2 = arith.constant 0 : i32
    return %c0_i32, %c0_i32_0, %c0_i32_1 : i32, i32, i32
  }
  func.func @transform_4(%arg0: i32) -> (i32, i32, i32) {
    %c0_i32 = arith.constant 0 : i32
    %c0_i32_0 = arith.constant 0 : i32
    %c0_i32_1 = arith.constant 0 : i32
    return %arg0, %c0_i32, %c0_i32_0 : i32, i32, i32
  }
  func.func @transform_5(%arg0: i32) -> (i32, i32, i32) {
    %c0_i32 = arith.constant 0 : i32
    %c0_i32_0 = arith.constant 0 : i32
    %c0_i32_1 = arith.constant 0 : i32
    return %arg0, %c0_i32, %c0_i32_0 : i32, i32, i32
  }
}

module attributes {stable_mosaic.version = 11 : i64} {
  func.func @_bn_relu_kernel(%arg0: i32, %arg1: memref<1x16x128xf32, #tpu.memory_space<vmem>>, %arg2: memref<1x128xf32, #tpu.memory_space<vmem>>, %arg3: memref<1x128xf32, #tpu.memory_space<vmem>>, %arg4: memref<1x16x128xf32, #tpu.memory_space<vmem>>) attributes {dimension_semantics = [#tpu.dimension_semantics<parallel>], iteration_bounds = array<i64: 2>, scalar_prefetch = 0 : i64, scratch_operands = 0 : i64, tpu.core_type = #tpu.core_type<tc>, window_params = [{transform_indices = @transform_0, window_bounds = array<i64: 1, 16, 128>}, {pipeline_mode = #tpu.pipeline_mode<synchronous>, transform_indices = @transform_1, window_bounds = array<i64: 1, 128>}, {pipeline_mode = #tpu.pipeline_mode<synchronous>, transform_indices = @transform_2, window_bounds = array<i64: 1, 128>}, {transform_indices = @transform_3, window_bounds = array<i64: 1, 16, 128>}]} {
    %c0 = arith.constant 0 : index
    %c0_0 = arith.constant 0 : index
    %c0_1 = arith.constant 0 : index
    %0 = vector.load %arg1[%c0, %c0_0, %c0_1] : memref<1x16x128xf32, #tpu.memory_space<vmem>>, vector<1x16x128xf32>
    %1 = vector.shape_cast %0 : vector<1x16x128xf32> to vector<16x128xf32>
    %c0_2 = arith.constant 0 : index
    %c0_3 = arith.constant 0 : index
    %2 = vector.load %arg2[%c0_2, %c0_3] : memref<1x128xf32, #tpu.memory_space<vmem>>, vector<1x128xf32>
    %3 = vector.broadcast %2 : vector<1x128xf32> to vector<16x128xf32>
    %4 = arith.mulf %1, %3 : vector<16x128xf32>
    %c0_4 = arith.constant 0 : index
    %c0_5 = arith.constant 0 : index
    %5 = vector.load %arg3[%c0_4, %c0_5] : memref<1x128xf32, #tpu.memory_space<vmem>>, vector<1x128xf32>
    %6 = vector.broadcast %5 : vector<1x128xf32> to vector<16x128xf32>
    %7 = arith.addf %4, %6 : vector<16x128xf32>
    %cst = arith.constant 0.000000e+00 : f32
    %8 = vector.broadcast %cst : f32 to vector<16x128xf32>
    %9 = arith.maximumf %7, %8 : vector<16x128xf32>
    %c0_6 = arith.constant 0 : index
    %c0_7 = arith.constant 0 : index
    %c0_8 = arith.constant 0 : index
    %10 = vector.load %arg4[%c0_6, %c0_7, %c0_8] : memref<1x16x128xf32, #tpu.memory_space<vmem>>, vector<1x16x128xf32>
    %11 = vector.shape_cast %10 : vector<1x16x128xf32> to vector<16x128xf32>
    %12 = vector.shape_cast %9 : vector<16x128xf32> to vector<1x16x128xf32>
    tpu.vector_store %arg4[%c0_6, %c0_7, %c0_8], %12 {strides = array<i32>} : memref<1x16x128xf32, #tpu.memory_space<vmem>>, vector<1x16x128xf32>,
    return
  }
  func.func @transform_0(%arg0: i32) -> (i32, i32, i32) {
    %c0_i32 = arith.constant 0 : i32
    %c0_i32_0 = arith.constant 0 : i32
    %c0_i32_1 = arith.constant 0 : i32
    return %arg0, %c0_i32, %c0_i32_0 : i32, i32, i32
  }
  func.func @transform_1(%arg0: i32) -> (i32, i32) {
    %c0_i32 = arith.constant 0 : i32
    %c0_i32_0 = arith.constant 0 : i32
    %c0_i32_1 = arith.constant 0 : i32
    return %c0_i32, %c0_i32_0 : i32, i32
  }
  func.func @transform_2(%arg0: i32) -> (i32, i32) {
    %c0_i32 = arith.constant 0 : i32
    %c0_i32_0 = arith.constant 0 : i32
    %c0_i32_1 = arith.constant 0 : i32
    return %c0_i32, %c0_i32_0 : i32, i32
  }
  func.func @transform_3(%arg0: i32) -> (i32, i32, i32) {
    %c0_i32 = arith.constant 0 : i32
    %c0_i32_0 = arith.constant 0 : i32
    %c0_i32_1 = arith.constant 0 : i32
    return %arg0, %c0_i32, %c0_i32_0 : i32, i32, i32
  }
}

</mosaic_0001>

<bundles_post_ra>
// kernel: vgg_block_apply.5
= control target key start
LH: loop header
LB: loop body
LE: loop exit
PB: predicated region body
PF: predicated region fallthrough
CT: control target
= control target key end

     0   :  { %s301_s12 = smov 0   ;;  %s318_s0 = inlined_call_operand.vmem [shape: f32[2,16,128], index: 0, kind: input, shape index: {}]   ;;  %s319_s1 = inlined_call_operand.vmem [shape: f32[1,128], index: 1, kind: input, shape index: {}]   ;;  %s320_s2 = inlined_call_operand.vmem [shape: f32[1,128], index: 2, kind: input, shape index: {}]   ;;  %s321_s3 = inlined_call_operand.vmem [shape: f32[2,16,128], index: 3, kind: output, shape index: {}]  }
   0x1 LB: > { %s250_s13 = sadd.s32 4294967295, %s279_s12   ;;  %p254_p0 = scmp.ge.s32.totalorder %s279_s12, 1  ;;  %s279_s12 = sphi %s301_s12, %s13_s12  }
   0x2   : > { %p137_p1 = scmp.lt.s32.totalorder %s279_s12, 3 }
   0x4   : > { %p138_p2 = pnand %p254_p0, %p137_p1 }
   0x5   : > { %p161_p3 = scmp.lt.s32.totalorder (!%p138_p2), %s250_s13, 1 }
   0x6   : > { %141 = sbr.rel (%p138_p2) target bundleno = 22 (0x16), region = 32 }
   0xb   : > { %s323_s13 = smov (!%p161_p3, %s250_s13), 1  ;;  %v259_v0 = vld [vmem:[%s319_s1] ss:$0 sm:$0xff] }
   0xc   : > { %s263_s14 = sshll.u32 %s323_s13, 4  ;;  %v260_v3 = vld [vmem:[%s320_s2] ss:$0 sm:$0xff] }
   0xd   : > { %s165_s19 = scalar_lea.vmem %s318_s0, %s263_s14  ;;  %s170_s24 = scalar_lea.vmem %s321_s3, %s263_s14 }
   0xe   : > { %v171_v1 = vld [vmem:[%s165_s19] sm:$0xff]  ;;  %v172_v2 = vld [vmem:[%s165_s19 + $0x8] sm:$0xff] }
   0xf   : > { %v180_v4 = vmul.f32 %v259_v0, %v171_v1  ;;  %v181_v5 = vmul.f32 %v259_v0, %v172_v2 }
  0x11   : > { %v189_v6 = vadd.f32 %v260_v3, %v180_v4  ;;  %v190_v7 = vadd.f32 %v260_v3, %v181_v5 }
  0x13   : > { %v191_v8 = vmax.f32 %v189_v6, 0.0  ;;  %v192_v9 = vmax.f32 %v190_v7, 0.0 }
  0x15   : > { %193 = vst [vmem:[%s170_s24] sm:$0xff] %v191_v8  ;;  %194 = vst [vmem:[%s170_s24 + $0x8] sm:$0xff] %v192_v9 }
  0x16 PF: > { %s13_s12 = sadd.s32 1, %s279_s12  }
  0x17   : > { %p10_p4 = scmp.ge.s32.totalorder %s13_s12, 4  }
  0x19   :  { %12 = sbr.rel (!%p10_p4) target bundleno = 1 (0x1), region = 62 }

// kernel: vgg_block_apply.3
= control target key start
LH: loop header
LB: loop body
LE: loop exit
PB: predicated region body
PF: predicated region fallthrough
CT: control target
= control target key end

     0   :  { %s983_s12 = smov 0   ;;  %s1162_s0 = inlined_call_operand.vmem [shape: bf16[2,16,128], index: 0, kind: input, shape index: {}]   ;;  %s1163_s1 = inlined_call_operand.vmem [shape: bf16[3,128,256], index: 1, kind: input, shape index: {}]   ;;  %s1164_s2 = inlined_call_operand.vmem [shape: f32[2,16,256], index: 2, kind: output, shape index: {0}]   ;;  %s1165_s3 = inlined_call_operand.vmem [shape: f32[2,2,256], index: 3, kind: output, shape index: {1}]  }
   0x1 LB: > { %s774_s13 = sadd.s32 4294967295, %s960_s12   ;;  %p778_p0 = scmp.ge.s32.totalorder %s960_s12, 1  ;;  %s960_s12 = sphi %s983_s12, %s14_s12  }
   0x2   : > { %p140_p1 = scmp.lt.s32.totalorder %s960_s12, 3 }
   0x4   : > { %p141_p2 = pnand %p778_p0, %p140_p1 }
   0x5   : > { %p169_p3 = scmp.lt.s32.totalorder (!%p141_p2), %s774_s13, 1 }
   0x6   : > { %144 = sbr.rel (%p141_p2) target bundleno = 298 (0x12a), region = 28 }
   0xb   : > { %v881_v0 = vld [vmem:[%s1163_s1 + $0x74] ss:$8 sps:$4 sm:$0xff]   ;;  %v962_v2 = vmov 0   ;;  %v885_v3 = vld [vmem:[%s1163_s1 + $0x70] ss:$8 sps:$4 sm:$0xff]   ;;  %s1167_s13 = smov (!%p169_p3, %s774_s13), 1 }
   0xc   : > { %v883_v1 = vld [vmem:[%s1163_s1 + $0xf4] ss:$8 sps:$4 sm:$0xff]   ;;  %356 = vmatprep.mubr.bf16.mxu0 %v962_v2  ;;  %480 = vmatprep.mubr.bf16.mxu1 %v962_v2  ;;  %v886_v4 = vld [vmem:[%s1163_s1 + $0xf0] ss:$8 sps:$4 sm:$0xff]   ;;  %v887_v5 = vld [vmem:[%s1163_s1 + $0x64] ss:$8 sps:$4 sm:$0xff]  }
   0xd   : > { %324 = vmatprep.subr.bf16.mxu0 %v881_v0  ;;  %448 = vmatprep.subr.bf16.mxu1 %v883_v1  ;;  %v889_v6 = vld [vmem:[%s1163_s1 + $0xe4] ss:$8 sps:$4 sm:$0xff]   ;;  %v891_v7 = vld [vmem:[%s1163_s1 + $0x60] ss:$8 sps:$4 sm:$0xff]   ;;  %v893_v9 = vld [vmem:[%s1163_s1 + $0x54] ss:$8 sps:$4 sm:$0xff]  }
   0xe   : > { %325 = vmatpush1.bf16.msra.mxu0 %v885_v3  ;;  %449 = vmatpush1.bf16.msra.mxu1 %v886_v4  ;;  %v892_v8 = vld [vmem:[%s1163_s1 + $0xe0] ss:$8 sps:$4 sm:$0xff]   ;;  %v895_v10 = vld [vmem:[%s1163_s1 + $0xd4] ss:$8 sps:$4 sm:$0xff]   ;;  %v897_v11 = vld [vmem:[%s1163_s1 + $0x50] ss:$8 sps:$4 sm:$0xff]  }
   0xf   : > { %326 = vmatprep.subr.bf16.mxu0 %v887_v5  ;;  %450 = vmatprep.subr.bf16.mxu1 %v889_v6  ;;  %v898_v12 = vld [vmem:[%s1163_s1 + $0xd0] ss:$8 sps:$4 sm:$0xff]   ;;  %v899_v13 = vld [vmem:[%s1163_s1 + $0x44] ss:$8 sps:$4 sm:$0xff]   ;;  %v903_v15 = vld [vmem:[%s1163_s1 + $0x40] ss:$8 sps:$4 sm:$0xff]  }
  0x10   : > { %v901_v14 = vld [vmem:[%s1163_s1 + $0xc4] ss:$8 sps:$4 sm:$0xff]   ;;  %v904_v16 = vld [vmem:[%s1163_s1 + $0xc0] ss:$8 sps:$4 sm:$0xff]   ;;  %v905_v17 = vld [vmem:[%s1163_s1 + $0x34] ss:$8 sps:$4 sm:$0xff]  }
  0x11   : > { %v907_v18 = vld [vmem:[%s1163_s1 + $0xb4] ss:$8 sps:$4 sm:$0xff]   ;;  %v909_v19 = vld [vmem:[%s1163_s1 + $0x30] ss:$8 sps:$4 sm:$0xff]   ;;  %v911_v21 = vld [vmem:[%s1163_s1 + $0x24] ss:$8 sps:$4 sm:$0xff]  }
  0x12   : > { %327 = vmatpush1.bf16.msra.mxu0 %v891_v7  ;;  %451 = vmatpush1.bf16.msra.mxu1 %v892_v8  ;;  %v910_v20 = vld [vmem:[%s1163_s1 + $0xb0] ss:$8 sps:$4 sm:$0xff]   ;;  %s869_s4 = sshll.u32 %s1167_s13, 3  ;;  %v913_v22 = vld [vmem:[%s1163_s1 + $0xa4] ss:$8 sps:$4 sm:$0xff]   ;;  %vm200_vm0 = vcmask 1040384  }
  0x13   : > { %328 = vmatprep.subr.bf16.mxu0 %v893_v9  ;;  %452 = vmatprep.subr.bf16.mxu1 %v895_v10  ;;  %v915_v23 = vld [vmem:[%s1163_s1 + $0x20] ss:$8 sps:$4 sm:$0xff]   ;;  %s173_s11 = scalar_lea.vmem %s1162_s0, %s869_s4  ;;  %v917_v25 = vld [vmem:[%s1163_s1 + $0x14] ss:$8 sps:$4 sm:$0xff]   ;;  %v921_v28 = vld [vmem:[%s1163_s1 + $0x10] ss:$8 sps:$4 sm:$0xff]  }
  0x14   : > { %v916_v24 = vld [vmem:[%s1163_s1 + $0xa0] ss:$8 sps:$4 sm:$0xff]   ;;  %v919_v26 = vld [vmem:[%s1163_s1 + $0x94] ss:$8 sps:$4 sm:$0xff]   ;;  %v922_v29 = vld [vmem:[%s1163_s1 + $0x90] ss:$8 sps:$4 sm:$0xff]  }
  0x15   : > { %v929_v27 = vld [vmem:[%s173_s11] sm:$0xff]   ;;  %vm201_vm1 = vsmask.f32 256  ;;  %v932_v38 = vld [vmem:[%s1163_s1 + $0x174] ss:$8 sps:$4 sm:$0xff]   ;;  %vm207_vm3 = vcmask 1047552  }
  0x16   : > { %329 = vmatpush1.bf16.msra.mxu0 %v897_v11  ;;  %453 = vmatpush1.bf16.msra.mxu1 %v898_v12  ;;  %v923_v30 = vld [vmem:[%s1163_s1 + $0x4] ss:$8 sps:$4 sm:$0xff]   ;;  %v193_v31 = vshrl.u32 %v929_v27, 16  ;;  %v196_v32 = vshll.u32 %v929_v27, 16  ;;  %v927_v35 = vld [vmem:[%s1163_s1] ss:$8 sps:$4 sm:$0xff]   ;;  %vm202_vm2 = vmand %vm200_vm0, %vm201_vm1 }
  0x17   : > { %330 = vmatprep.subr.bf16.mxu0 %v899_v13  ;;  %454 = vmatprep.subr.bf16.mxu1 %v901_v14  ;;  %v925_v33 = vld [vmem:[%s1163_s1 + $0x84] ss:$8 sps:$4 sm:$0xff]   ;;  %v928_v36 = vld [vmem:[%s1163_s1 + $0x80] ss:$8 sps:$4 sm:$0xff]   ;;  %v930_v40 = vld [vmem:[%s1163_s1 + $0x170] ss:$8 sps:$4 sm:$0xff]  }
  0x18   : > { %v195_v34 = vrot.slane %v193_v31, 7  ;;  %v935_v41 = vld [vmem:[%s1163_s1 + $0x164] ss:$8 sps:$4 sm:$0xff]   ;;  %v933_v42 = vld [vmem:[%s1163_s1 + $0x160] ss:$8 sps:$4 sm:$0xff]   ;;  %v204_v53 = vrot.slane %v196_v32, 1 }
  0x19   : > { %v938_v43 = vld [vmem:[%s1163_s1 + $0x154] ss:$8 sps:$4 sm:$0xff]   ;;  %v936_v44 = vld [vmem:[%s1163_s1 + $0x150] ss:$8 sps:$4 sm:$0xff]   ;;  %v941_v45 = vld [vmem:[%s1163_s1 + $0x144] ss:$8 sps:$4 sm:$0xff]  }
  0x1a   : > { %331 = vmatpush1.bf16.msra.mxu0 %v903_v15  ;;  %455 = vmatpush1.bf16.msra.mxu1 %v904_v16  ;;  %v198_v37 = vor.u32 %v196_v32, %v195_v34  ;;  %v939_v46 = vld [vmem:[%s1163_s1 + $0x140] ss:$8 sps:$4 sm:$0xff]   ;;  %v944_v47 = vld [vmem:[%s1163_s1 + $0x134] ss:$8 sps:$4 sm:$0xff]   ;;  %v942_v48 = vld [vmem:[%s1163_s1 + $0x130] ss:$8 sps:$4 sm:$0xff]   ;;  %v205_v56 = vor.u32 %v204_v53, %v193_v31 }
  0x1b   : > { %332 = vmatprep.subr.bf16.mxu0 %v905_v17  ;;  %456 = vmatprep.subr.bf16.mxu1 %v907_v18  ;;  %v947_v49 = vld [vmem:[%s1163_s1 + $0x124] ss:$8 sps:$4 sm:$0xff]   ;;  %v945_v50 = vld [vmem:[%s1163_s1 + $0x120] ss:$8 sps:$4 sm:$0xff]   ;;  %v950_v51 = vld [vmem:[%s1163_s1 + $0x114] ss:$8 sps:$4 sm:$0xff]  }
  0x1c   : > { %v203_v39 = vsel %vm202_vm2, 0, %v198_v37  ;;  %v948_v52 = vld [vmem:[%s1163_s1 + $0x110] ss:$8 sps:$4 sm:$0xff]   ;;  %v953_v54 = vld [vmem:[%s1163_s1 + $0x104] ss:$8 sps:$4 sm:$0xff]   ;;  %s870_s14 = sshll.u32 %s1167_s13, 5 }
  0x1d   : > { %vm208_vm4 = vsmask.f32 7424  ;;  %v951_v55 = vld [vmem:[%s1163_s1 + $0x100] ss:$8 sps:$4 sm:$0xff]   ;;  %s178_s17 = scalar_lea.vmem %s1164_s2, %s870_s14  ;;  %s871_s18 = sshll.u32 %s1167_s13, 2 }
  0x1e   : > { %333 = vmatpush1.bf16.msra.mxu0 %v909_v19  ;;  %457 = vmatpush1.bf16.msra.mxu1 %v910_v20  ;;  %vm209_vm5 = vmand %vm207_vm3, %vm208_vm4  ;;  %s183_s21 = scalar_lea.vmem %s1165_s3, %s871_s18 }
  0x1f   : > { %334 = vmatprep.subr.bf16.mxu0 %v911_v21  ;;  %458 = vmatprep.subr.bf16.mxu1 %v913_v22  ;;  %v210_v57 = vsel %vm209_vm5, %v205_v56, 0 }
  0x22   : > { %335 = vmatpush1.bf16.msra.mxu0 %v915_v23  ;;  %459 = vmatpush1.bf16.msra.mxu1 %v916_v24 }
  0x23   : > { %336 = vmatprep.subr.bf16.mxu0 %v917_v25  ;;  %460 = vmatprep.subr.bf16.mxu1 %v919_v26 }
  0x26   : > { %337 = vmatpush1.bf16.msra.mxu0 %v921_v28  ;;  %461 = vmatpush1.bf16.msra.mxu1 %v922_v29 }
  0x27   : > { %338 = vmatprep.subr.bf16.mxu0 %v923_v30  ;;  %462 = vmatprep.subr.bf16.mxu1 %v925_v33 }
  0x2a   : > { %339 = vmatpush1.bf16.msra.mxu0 %v927_v35  ;;  %463 = vmatpush1.bf16.msra.mxu1 %v928_v36 }
  0x2b   : > { %588 = vmatprep.subr.bf16.mxu0 %v932_v38 }
  0x2d   : > { %357 = vmatmul.mubr.bf16.vlgmr.msra.gmra.mxu0 %v203_v39  ;;  %481 = vmatmul.mubr.bf16.vlgmr.msra.gmra.mxu1 %v929_v27 }
  0x2e   : > { %589 = vmatpush1.bf16.msra.mxu0 %v930_v40  ;;  %620 = vmatprep.mubr.bf16.mxu0 %v962_v2 }
  0x2f   : > { %590 = vmatprep.subr.bf16.mxu0 %v935_v41 }
  0x32   : > { %591 = vmatpush1.bf16.msra.mxu0 %v933_v42 }
  0x33   : > { %592 = vmatprep.subr.bf16.mxu0 %v938_v43 }
  0x36   : > { %593 = vmatpush1.bf16.msra.mxu0 %v936_v44 }
  0x37   : > { %594 = vmatprep.subr.bf16.mxu0 %v941_v45 }
  0x3a   : > { %595 = vmatpush1.bf16.msra.mxu0 %v939_v46 }
  0x3b   : > { %596 = vmatprep.subr.bf16.mxu0 %v944_v47 }
  0x3e   : > { %597 = vmatpush1.bf16.msra.mxu0 %v942_v48 }
  0x3f   : > { %598 = vmatprep.subr.bf16.mxu0 %v947_v49 }
  0x42   : > { %599 = vmatpush1.bf16.msra.mxu0 %v945_v50 }
  0x43   : > { %600 = vmatprep.subr.bf16.mxu0 %v950_v51 }
  0x46   : > { %601 = vmatpush1.bf16.msra.mxu0 %v948_v52 }
  0x47   : > { %602 = vmatprep.subr.bf16.mxu0 %v953_v54 }
  0x4a   : > { %603 = vmatpush1.bf16.msra.mxu0 %v951_v55 }
  0x4d   : > { %621 = vmatmul.mubr.bf16.vlgmr.msra.gmra.mxu0 %v210_v57 }
  0xed   : > { %v358_v58 = vpop.f32.mrf.mxu0  ;;  %v482_v59 = vpop.f32.mrf.mxu1 }
  0xee   : > { %v483_v1 = vadd.f32 %v482_v59, %v358_v58 }
  0xef   : > { %v360_v60 = vpop.f32.mrf.mxu0  ;;  %v484_v61 = vpop.f32.mrf.mxu1 }
  0xf0   : > { %v485_v3 = vadd.f32 %v484_v61, %v360_v60 }
  0xf1   : > { %v362_v62 = vpop.f32.mrf.mxu0  ;;  %v486_v63 = vpop.f32.mrf.mxu1 }
  0xf2   : > { %v487_v7 = vadd.f32 %v486_v63, %v362_v62 }
  0xf3   : > { %v364_v0 = vpop.f32.mrf.mxu0  ;;  %v488_v5 = vpop.f32.mrf.mxu1 }
  0xf4   : > { %v489_v10 = vadd.f32 %v488_v5, %v364_v0 }
 0x10d   : > { %v622_v2 = vpop.f32.mrf.mxu0 }
 0x10e   : > { %v631_v4 = vadd.f32 %v622_v2, %v483_v1 }
 0x10f   : > { %v624_v6 = vpop.f32.mrf.mxu0 }
 0x110   : > { %635 = vst [vmem:[%s178_s17] sm:$0xff] %v631_v4  ;;  %v632_v8 = vadd.f32 %v624_v6, %v485_v3  ;;  %v653_v13 = vmul.f32 %v631_v4, %v631_v4 }
 0x111   : > { %v626_v9 = vpop.f32.mrf.mxu0 }
 0x112   : > { %636 = vst [vmem:[%s178_s17 + $0x8] sm:$0xff] %v632_v8  ;;  %v633_v11 = vadd.f32 %v626_v9, %v487_v7  ;;  %v654_v17 = vmul.f32 %v632_v8, %v632_v8 }
 0x113   : > { %v628_v12 = vpop.f32.mrf.mxu0 }
 0x114   : > { %637 = vst [vmem:[%s178_s17 + $0x10] sm:$0xff] %v633_v11  ;;  %v639_v14 = vadd.f32 %v633_v11, %v631_v4  ;;  %v655_v15 = vmul.f32 %v633_v11, %v633_v11  ;;  %v634_v16 = vadd.f32 %v628_v12, %v489_v10 }
 0x116   : > { %v640_v18 = vrot.slane %v639_v14, 4  ;;  %v657_v19 = vadd.f32 %v655_v15, %v653_v13  ;;  %638 = vst [vmem:[%s178_s17 + $0x18] sm:$0xff] %v634_v16  ;;  %v646_v20 = vadd.f32 %v634_v16, %v632_v8  ;;  %v656_v21 = vmul.f32 %v634_v16, %v634_v16 }
 0x118   : > { %v641_v22 = vadd.f32 %v640_v18, %v639_v14  ;;  %v658_v23 = vrot.slane %v657_v19, 4  ;;  %v647_v24 = vrot.slane %v646_v20, 4  ;;  %v664_v25 = vadd.f32 %v656_v21, %v654_v17 }
 0x11a   : > { %v642_v26 = vrot.slane %v641_v22, 2  ;;  %v659_v27 = vadd.f32 %v658_v23, %v657_v19  ;;  %v648_v28 = vadd.f32 %v647_v24, %v646_v20  ;;  %v665_v29 = vrot.slane %v664_v25, 4 }
 0x11c   : > { %v643_v30 = vadd.f32 %v642_v26, %v641_v22  ;;  %v660_v31 = vrot.slane %v659_v27, 2  ;;  %v649_v32 = vrot.slane %v648_v28, 2  ;;  %v666_v33 = vadd.f32 %v665_v29, %v664_v25 }
 0x11e   : > { %v661_v34 = vadd.f32 %v660_v31, %v659_v27  ;;  %v650_v35 = vadd.f32 %v649_v32, %v648_v28  ;;  %v667_v36 = vrot.slane %v666_v33, 2  ;;  %v644_v37 = vrot.slane %v643_v30, 1 }
 0x120   : > { %v662_v38 = vrot.slane %v661_v34, 1  ;;  %v651_v39 = vrot.slane %v650_v35, 1  ;;  %v668_v40 = vadd.f32 %v667_v36, %v666_v33  ;;  %v645_v43 = vadd.f32 %v644_v37, %v643_v30 }
 0x122   : > { %v663_v41 = vadd.f32 %v662_v38, %v661_v34  ;;  %v669_v42 = vrot.slane %v668_v40, 1  ;;  %v652_v44 = vadd.f32 %v651_v39, %v650_v35 }
 0x124   : > { %v670_v45 = vadd.f32 %v669_v42, %v668_v40  ;;  %v672_v46 = vsel %vm200_vm0, %v645_v43, %v663_v41 }
 0x126   : > { %v673_v47 = vsel %vm200_vm0, %v652_v44, %v670_v45 }
 0x127   : > { %v676_v48 = vcombine.low %v672_v46, %v673_v47 }
 0x129   : > { %866 = vst.sshfl [vmem:[%s183_s21] sm:$0x33 pattern:$0x76325410] %v676_v48 }
 0x12a PF: > { %s14_s12 = sadd.s32 1, %s960_s12  }
 0x12b   : > { %p11_p4 = scmp.ge.s32.totalorder %s14_s12, 4  }
 0x12d   :  { %13 = sbr.rel (!%p11_p4) target bundleno = 1 (0x1), region = 72 }

// kernel: vgg_block_apply.4
= control target key start
LH: loop header
LB: loop body
LE: loop exit
PB: predicated region body
PF: predicated region fallthrough
CT: control target
= control target key end

     0   :  { %s1215_s18 = smov 0   ;;  %s1404_s0 = inlined_call_operand.vmem [shape: f32[2,16,256], index: 0, kind: input, shape index: {}]   ;;  %s1405_s1 = inlined_call_operand.vmem [shape: f32[1,256], index: 1, kind: input, shape index: {}]   ;;  %s1406_s2 = inlined_call_operand.vmem [shape: f32[1,256], index: 2, kind: input, shape index: {}]   ;;  %s1407_s3 = inlined_call_operand.vmem [shape: bf16[3,256,128], index: 3, kind: input, shape index: {}]   ;;  %s1408_s4 = inlined_call_operand.vmem [shape: f32[2,16,128], index: 4, kind: output, shape index: {0}]   ;;  %s1409_s5 = inlined_call_operand.vmem [shape: f32[2,2,128], index: 5, kind: output, shape index: {1}]  }
   0x1 LB: > { %s929_s19 = sadd.s32 4294967295, %s1183_s18   ;;  %p933_p0 = scmp.ge.s32.totalorder %s1183_s18, 1  ;;  %s1183_s18 = sphi %s1215_s18, %s16_s18  }
   0x2   : > { %p190_p1 = scmp.lt.s32.totalorder %s1183_s18, 3 }
   0x4   : > { %p191_p2 = pnand %p933_p0, %p190_p1 }
   0x5   : > { %p222_p3 = scmp.lt.s32.totalorder (!%p191_p2), %s929_s19, 1 }
   0x6   : > { %194 = sbr.rel (%p191_p2) target bundleno = 298 (0x12a), region = 36 }
   0xb   : > { %v1129_v0 = vld [vmem:[%s1407_s3 + $0x78] sm:$0xff]   ;;  %v1133_v4 = vld [vmem:[%s1407_s3 + $0x70] sm:$0xff]   ;;  %v1137_v8 = vld [vmem:[%s1407_s3 + $0x68] sm:$0xff]   ;;  %v243_v21 = vlaneseq  ;;  %s1413_s19 = smov (!%p222_p3, %s929_s19), 1  ;;  %vm295_vm0 = vcmask 1040384   ;;  %vm306_vm2 = vcmask 1047552  }
   0xc   : > { %v1130_v1 = vld [vmem:[%s1407_s3 + $0xf8] sm:$0xff]   ;;  %1055 = vmatprep.subr.bf16.mxu0 %v1129_v0  ;;  %v1134_v5 = vld [vmem:[%s1407_s3 + $0xf0] sm:$0xff]   ;;  %v1138_v9 = vld [vmem:[%s1407_s3 + $0xe8] sm:$0xff]   ;;  %s1053_s28 = sshll.u32 %s1413_s19, 5  ;;  %vm296_vm1 = vsmask.f32 256 }
   0xd   : > { %v1131_v2 = vld [vmem:[%s1407_s3 + $0x38] sm:$0xff]   ;;  %1077 = vmatprep.subr.bf16.mxu1 %v1130_v1  ;;  %v1135_v6 = vld [vmem:[%s1407_s3 + $0x30] sm:$0xff]   ;;  %v1139_v10 = vld [vmem:[%s1407_s3 + $0x28] sm:$0xff]   ;;  %v244_v26 = vshrl.u32 %v243_v21, 7  ;;  %s226_s12 = scalar_lea.vmem %s1404_s0, %s1053_s28  ;;  %vm307_vm4 = vsmask.f32 7424 }
   0xe   : > { %v1132_v3 = vld [vmem:[%s1407_s3 + $0xb8] sm:$0xff]   ;;  %1056 = vmatpush3.bf16.msra.mxu0 %v1131_v2  ;;  %v1136_v7 = vld [vmem:[%s1407_s3 + $0xb0] sm:$0xff]   ;;  %v1140_v11 = vld [vmem:[%s1407_s3 + $0xa8] sm:$0xff]   ;;  %s1054_s7 = sshll.u32 %s1413_s19, 4  ;;  %s938_s11 = sshll.u32 %s1413_s19, 1 }
   0xf   : > { %1078 = vmatpush3.bf16.msra.mxu1 %v1132_v3  ;;  %1057 = vmatprep.subr.bf16.mxu0 %v1133_v4  ;;  %v1141_v12 = vld [vmem:[%s1407_s3 + $0x60] sm:$0xff]   ;;  %v1145_v16 = vld [vmem:[%s1407_s3 + $0x58] sm:$0xff]   ;;  %v1149_v20 = vld [vmem:[%s1407_s3 + $0x50] sm:$0xff]   ;;  %v249_v31 = vsub.s32 1, %v244_v26  ;;  %v245_v33 = vsub.s32 0, %v244_v26  ;;  %s231_s10 = scalar_lea.vmem %s1408_s4, %s1054_s7  ;;  %s235_s14 = scalar_lea.vmem %s1409_s5, %s938_s11 }
  0x10   : > { %1079 = vmatprep.subr.bf16.mxu1 %v1134_v5  ;;  %v1142_v13 = vld [vmem:[%s1407_s3 + $0xe0] sm:$0xff]   ;;  %v1146_v17 = vld [vmem:[%s1407_s3 + $0xd8] sm:$0xff]   ;;  %v1150_v22 = vld [vmem:[%s1407_s3 + $0xd0] sm:$0xff]  }
  0x11   : > { %v1143_v14 = vld [vmem:[%s1407_s3 + $0x20] sm:$0xff]   ;;  %v1147_v18 = vld [vmem:[%s1407_s3 + $0x18] sm:$0xff]   ;;  %v1151_v23 = vld [vmem:[%s1407_s3 + $0x10] sm:$0xff]  }
  0x12   : > { %1058 = vmatpush3.bf16.msra.mxu0 %v1135_v6  ;;  %v1144_v15 = vld [vmem:[%s1407_s3 + $0xa0] sm:$0xff]   ;;  %v1148_v19 = vld [vmem:[%s1407_s3 + $0x98] sm:$0xff]   ;;  %v1152_v24 = vld [vmem:[%s1407_s3 + $0x90] sm:$0xff]  }
  0x13   : > { %1080 = vmatpush3.bf16.msra.mxu1 %v1136_v7  ;;  %1059 = vmatprep.subr.bf16.mxu0 %v1137_v8  ;;  %v1153_v25 = vld [vmem:[%s1407_s3 + $0x48] sm:$0xff]   ;;  %v1157_v30 = vld [vmem:[%s1407_s3 + $0x40] sm:$0xff]   ;;  %v240_v37 = vld [vmem:[%s226_s12 + $0x18] sm:$0xff] }
  0x14   : > { %1081 = vmatprep.subr.bf16.mxu1 %v1138_v9  ;;  %v1154_v27 = vld [vmem:[%s1407_s3 + $0xc8] sm:$0xff]   ;;  %v1158_v32 = vld [vmem:[%s1407_s3 + $0xc0] sm:$0xff]   ;;  %v239_v44 = vld [vmem:[%s226_s12 + $0x10] sm:$0xff] }
  0x15   : > { %v1155_v28 = vld [vmem:[%s1407_s3 + $0x8] sm:$0xff]   ;;  %v1159_v34 = vld [vmem:[%s1407_s3] sm:$0xff]   ;;  %v1161_v50 = vld [vmem:[%s1407_s3 + $0x178] sm:$0xff]  }
  0x16   : > { %1060 = vmatpush3.bf16.msra.mxu0 %v1139_v10  ;;  %v1156_v29 = vld [vmem:[%s1407_s3 + $0x88] sm:$0xff]   ;;  %v1160_v35 = vld [vmem:[%s1407_s3 + $0x80] sm:$0xff]   ;;  %vm297_vm3 = vmand %vm295_vm0, %vm296_vm1 }
  0x17   : > { %1082 = vmatpush3.bf16.msra.mxu1 %v1140_v11  ;;  %1061 = vmatprep.subr.bf16.mxu0 %v1141_v12  ;;  %v238_v36 = vld [vmem:[%s226_s12 + $0x8] sm:$0xff]  ;;  %v241_v38 = vld [vmem:[%s1405_s1] sm:$0x3]  ;;  %v1162_v5 = vld [vmem:[%s1407_s3 + $0x138] sm:$0xff]  }
  0x18   : > { %1083 = vmatprep.subr.bf16.mxu1 %v1142_v13  ;;  %v250_v39 = vrot.slane %v241_v38, %v249_v31  ;;  %v257_v40 = vld [vmem:[%s1406_s2] sm:$0x3]  ;;  %v246_v42 = vrot.slane %v241_v38, %v245_v33  ;;  %vm1342_vm5 = vmand %vm306_vm2, %vm307_vm4  ;;  %v1163_v10 = vld [vmem:[%s1407_s3 + $0x170] sm:$0xff]  }
  0x19   : > { %v237_v41 = vld [vmem:[%s226_s12] sm:$0xff]  ;;  %v266_v43 = vrot.slane %v257_v40, %v249_v31  ;;  %v262_v45 = vrot.slane %v257_v40, %v245_v33  ;;  %v1164_v13 = vld [vmem:[%s1407_s3 + $0x130] sm:$0xff]  }
  0x1a   : > { %1062 = vmatpush3.bf16.msra.mxu0 %v1143_v14  ;;  %v254_v46 = vmul.f32 %v250_v39, %v238_v36  ;;  %v256_v47 = vmul.f32 %v250_v39, %v240_v37  ;;  %v253_v48 = vmul.f32 %v246_v42, %v237_v41  ;;  %v255_v49 = vmul.f32 %v246_v42, %v239_v44  ;;  %v1165_v14 = vld [vmem:[%s1407_s3 + $0x168] sm:$0xff]   ;;  %v1172_v21 = vld [vmem:[%s1407_s3 + $0x110] sm:$0xff]   ;;  %v1176_v26 = vld [vmem:[%s1407_s3 + $0x100] sm:$0xff]  }
  0x1b   : > { %1084 = vmatpush3.bf16.msra.mxu1 %v1144_v15  ;;  %1063 = vmatprep.subr.bf16.mxu0 %v1145_v16  ;;  %v1166_v15 = vld [vmem:[%s1407_s3 + $0x128] sm:$0xff]   ;;  %v1167_v16 = vld [vmem:[%s1407_s3 + $0x160] sm:$0xff]  }
  0x1c   : > { %1085 = vmatprep.subr.bf16.mxu1 %v1146_v17  ;;  %v270_v51 = vadd.f32 %v266_v43, %v254_v46  ;;  %v272_v52 = vadd.f32 %v266_v43, %v256_v47  ;;  %v269_v53 = vadd.f32 %v262_v45, %v253_v48  ;;  %v271_v54 = vadd.f32 %v262_v45, %v255_v49  ;;  %v1168_v17 = vld [vmem:[%s1407_s3 + $0x120] sm:$0xff]  }
  0x1e   : > { %1064 = vmatpush3.bf16.msra.mxu0 %v1147_v18  ;;  %v274_v55 = vmax.f32 %v270_v51, 0.0  ;;  %v276_v56 = vmax.f32 %v272_v52, 0.0  ;;  %v273_v57 = vmax.f32 %v269_v53, 0.0  ;;  %v275_v58 = vmax.f32 %v271_v54, 0.0  ;;  %v1169_v18 = vld [vmem:[%s1407_s3 + $0x158] sm:$0xff]  }
  0x1f   : > { %1086 = vmatpush3.bf16.msra.mxu1 %v1148_v19  ;;  %1065 = vmatprep.subr.bf16.mxu0 %v1149_v20  ;;  %v1170_v19 = vld [vmem:[%s1407_s3 + $0x118] sm:$0xff]   ;;  %v1171_v20 = vld [vmem:[%s1407_s3 + $0x150] sm:$0xff]  }
  0x20   : > { %1087 = vmatprep.subr.bf16.mxu1 %v1150_v22  ;;  %v278_v59 = vpack.c.bf16 %v276_v56, %v274_v55  ;;  %v277_v60 = vpack.c.bf16 %v275_v58, %v273_v57  ;;  %v1173_v22 = vld [vmem:[%s1407_s3 + $0x148] sm:$0xff]  }
  0x22   : > { %1066 = vmatpush3.bf16.msra.mxu0 %v1151_v23  ;;  %v287_v61 = vshrl.u32 %v278_v59, 16  ;;  %v290_v62 = vshll.u32 %v278_v59, 16  ;;  %641 = vmatprep.mubr.bf16.mxu1 %v278_v59  ;;  %v280_v63 = vshrl.u32 %v277_v60, 16  ;;  %v283_v0 = vshll.u32 %v277_v60, 16  ;;  %v1174_v23 = vld [vmem:[%s1407_s3 + $0x108] sm:$0xff]  }
  0x23   : > { %1088 = vmatpush3.bf16.msra.mxu1 %v1152_v24  ;;  %1067 = vmatprep.subr.bf16.mxu0 %v1153_v25  ;;  %v1175_v25 = vld [vmem:[%s1407_s3 + $0x140] sm:$0xff]  }
  0x24   : > { %1089 = vmatprep.subr.bf16.mxu1 %v1154_v27  ;;  %v289_v1 = vrot.slane %v287_v61, 7  ;;  %v282_v2 = vrot.slane %v280_v63, 7  ;;  %v302_v6 = vrot.slane %v290_v62, 1  ;;  %v300_v24 = vrot.slane %v283_v0, 1 }
  0x26   : > { %1068 = vmatpush3.bf16.msra.mxu0 %v1155_v28  ;;  %v292_v3 = vor.u32 %v290_v62, %v289_v1  ;;  %v285_v4 = vor.u32 %v283_v0, %v282_v2  ;;  %v303_v11 = vor.u32 %v302_v6, %v287_v61  ;;  %v301_v27 = vor.u32 %v300_v24, %v280_v63 }
  0x27   : > { %1090 = vmatpush3.bf16.msra.mxu1 %v1156_v29  ;;  %1069 = vmatprep.subr.bf16.mxu0 %v1157_v30 }
  0x28   : > { %1091 = vmatprep.subr.bf16.mxu1 %v1158_v32  ;;  %v299_v8 = vsel %vm297_vm3, 0, %v292_v3  ;;  %v298_v9 = vsel %vm297_vm3, 0, %v285_v4  ;;  %v310_v12 = vsel %vm1342_vm5, %v303_v11, 0  ;;  %v309_v28 = vsel %vm1342_vm5, %v301_v27, 0 }
  0x29   : > { %504 = vmatprep.mubr.bf16.mxu0 %v299_v8 }
  0x2a   : > { %1070 = vmatpush3.bf16.msra.mxu0 %v1159_v34 }
  0x2b   : > { %1092 = vmatpush3.bf16.msra.mxu1 %v1160_v35  ;;  %1099 = vmatprep.subr.bf16.mxu0 %v1161_v50 }
  0x2d   : > { %505 = vmatmul.mubr.bf16.vlgmr.msra.gmra.mxu0 %v298_v9 }
  0x2e   : > { %642 = vmatmul.mubr.bf16.vlgmr.msra.gmra.mxu1 %v277_v60  ;;  %1100 = vmatpush3.bf16.msra.mxu0 %v1162_v5 }
  0x2f   : > { %811 = vmatprep.mubr.bf16.mxu0 %v310_v12  ;;  %1101 = vmatprep.subr.bf16.mxu0 %v1163_v10 }
  0x32   : > { %1102 = vmatpush3.bf16.msra.mxu0 %v1164_v13 }
  0x33   : > { %1103 = vmatprep.subr.bf16.mxu0 %v1165_v14 }
  0x36   : > { %1104 = vmatpush3.bf16.msra.mxu0 %v1166_v15 }
  0x37   : > { %1105 = vmatprep.subr.bf16.mxu0 %v1167_v16 }
  0x3a   : > { %1106 = vmatpush3.bf16.msra.mxu0 %v1168_v17 }
  0x3b   : > { %1107 = vmatprep.subr.bf16.mxu0 %v1169_v18 }
  0x3e   : > { %1108 = vmatpush3.bf16.msra.mxu0 %v1170_v19 }
  0x3f   : > { %1109 = vmatprep.subr.bf16.mxu0 %v1171_v20 }
  0x42   : > { %1110 = vmatpush3.bf16.msra.mxu0 %v1172_v21 }
  0x43   : > { %1111 = vmatprep.subr.bf16.mxu0 %v1173_v22 }
  0x46   : > { %1112 = vmatpush3.bf16.msra.mxu0 %v1174_v23 }
  0x47   : > { %1113 = vmatprep.subr.bf16.mxu0 %v1175_v25 }
  0x4a   : > { %1114 = vmatpush3.bf16.msra.mxu0 %v1176_v26 }
  0x4d   : > { %812 = vmatmul.mubr.bf16.vlgmr.msra.gmra.mxu0 %v309_v28 }
  0xed   : > { %v1071_v29 = vpop.f32.mrf.mxu0 }
  0xee   : > { %v1093_v30 = vpop.f32.mrf.mxu1 }
  0xef   : > { %v1072_v31 = vpop.f32.mrf.mxu0 }
  0xf0   : > { %v1094_v32 = vpop.f32.mrf.mxu1  ;;  %v1073_v36 = vadd.f32 %v1072_v31, %v1071_v29 }
  0xf1   : > { %v1074_v33 = vpop.f32.mrf.mxu0  ;;  %v1095_v37 = vadd.f32 %v1094_v32, %v1093_v30 }
  0xf2   : > { %v1096_v34 = vpop.f32.mrf.mxu1 }
  0xf3   : > { %v1075_v35 = vpop.f32.mrf.mxu0  ;;  %v644_v41 = vadd.f32 %v1095_v37, %v1073_v36 }
  0xf4   : > { %v1097_v38 = vpop.f32.mrf.mxu1  ;;  %v1076_v42 = vadd.f32 %v1075_v35, %v1074_v33 }
  0xf5   : > { %v1098_v43 = vadd.f32 %v1097_v38, %v1096_v34 }
  0xf7   : > { %v647_v48 = vadd.f32 %v1098_v43, %v1076_v42 }
 0x10d   : > { %v1115_v39 = vpop.f32.mrf.mxu0 }
 0x10f   : > { %v1116_v40 = vpop.f32.mrf.mxu0 }
 0x110   : > { %v1117_v44 = vadd.f32 %v1116_v40, %v1115_v39 }
 0x111   : > { %v1118_v45 = vpop.f32.mrf.mxu0 }
 0x112   : > { %v820_v46 = vadd.f32 %v1117_v44, %v644_v41 }
 0x113   : > { %v1119_v47 = vpop.f32.mrf.mxu0 }
 0x114   : > { %822 = vst [vmem:[%s231_s10] sm:$0xff] %v820_v46  ;;  %v1120_v49 = vadd.f32 %v1119_v47, %v1118_v45  ;;  %v831_v51 = vmul.f32 %v820_v46, %v820_v46 }
 0x116   : > { %v821_v50 = vadd.f32 %v1120_v49, %v647_v48 }
 0x118   : > { %823 = vst [vmem:[%s231_s10 + $0x8] sm:$0xff] %v821_v50  ;;  %v824_v52 = vadd.f32 %v821_v50, %v820_v46  ;;  %v832_v53 = vmul.f32 %v821_v50, %v821_v50 }
 0x11a   : > { %v825_v54 = vrot.slane %v824_v52, 4  ;;  %v833_v55 = vadd.f32 %v832_v53, %v831_v51 }
 0x11c   : > { %v826_v56 = vadd.f32 %v825_v54, %v824_v52  ;;  %v834_v57 = vrot.slane %v833_v55, 4 }
 0x11e   : > { %v827_v58 = vrot.slane %v826_v56, 2  ;;  %v835_v59 = vadd.f32 %v834_v57, %v833_v55 }
 0x120   : > { %v828_v60 = vadd.f32 %v827_v58, %v826_v56  ;;  %v836_v61 = vrot.slane %v835_v59, 2 }
 0x122   : > { %v829_v62 = vrot.slane %v828_v60, 1  ;;  %v837_v63 = vadd.f32 %v836_v61, %v835_v59 }
 0x124   : > { %v838_v0 = vrot.slane %v837_v63, 1  ;;  %v830_v1 = vadd.f32 %v829_v62, %v828_v60 }
 0x126   : > { %v839_v2 = vadd.f32 %v838_v0, %v837_v63 }
 0x128   : > { %v841_v3 = vsel %vm295_vm0, %v830_v1, %v839_v2 }
 0x129   : > { %842 = vst [vmem:[%s235_s14] sm:$0x3] %v841_v3 }
 0x12a PF: > { %s16_s18 = sadd.s32 1, %s1183_s18  }
 0x12b   : > { %p13_p4 = scmp.ge.s32.totalorder %s16_s18, 4  }
 0x12d   :  { %15 = sbr.rel (!%p13_p4) target bundleno = 1 (0x1), region = 80 }

</bundles_post_ra>
